<compile_context>
chip_gen: v5e
topology: v5e:2x2
jax: 0.10.0
libtpu: 0.0.40
codegen_flags: <defaults>
</compile_context>

<pallas_src>
import jax
import jax.numpy as jnp
from jax.experimental import pallas as pl
from jax.experimental.pallas import tpu as pltpu


def _single_pass_kernel(x_ref, wt_ref, b_ref, o_ref):
    """out_tile = x_tile @ W^T + b + x_tile   (tk = tn = H, no K loop)."""
    acc = jnp.dot(x_ref[...], wt_ref[...], preferred_element_type=jnp.float32)
    y = acc + b_ref[...] + x_ref[...].astype(jnp.float32)
    o_ref[...] = y.astype(o_ref.dtype)


def _ktiled_kernel(x_ref, wt_ref, b_ref, o_ref, acc_ref):
    """Output-stationary K-tiled matmul; residual folded in at k == j.

    Correct because tn == tk and both the N and K grid axes tile the same H,
    so the (i, k) LHS tile *is* the (i, j) residual tile exactly when k == j.
    """
    j = pl.program_id(1)
    k = pl.program_id(2)

    @pl.when(k == 0)
    def _init():
        acc_ref[...] = jnp.zeros_like(acc_ref)

    acc_ref[...] += jnp.dot(
        x_ref[...], wt_ref[...], preferred_element_type=jnp.float32
    )

    @pl.when(k == j)
    def _residual():
        acc_ref[...] += x_ref[...].astype(jnp.float32)

    @pl.when(k == pl.num_programs(2) - 1)
    def _finalize():
        o_ref[...] = (acc_ref[...] + b_ref[...]).astype(o_ref.dtype)


def _divisor_tile(dim, cap, align):
    """Largest t <= cap with t % align == 0 and dim % t == 0, else dim."""
    if dim <= cap:
        return dim
    t = (cap // align) * align
    while t >= align:
        if dim % t == 0:
            return t
        t -= align
    return dim


def _vmem_budget_bytes():
    try:
        cap = pltpu.get_tpu_info().vmem_capacity_bytes
    except Exception:
        cap = 64 << 20  # conservative: v7x has 64 MiB physical per TC
    return int(cap * 0.7)


def resnet_forward(x, w_t, b, *, tm=None, tn=None, tk=None, out_dtype=None,
                   vmem_budget_bytes=None):
    """ResNet wrapper around a Linear module: out = x @ w_t + b + x.

    x   : [B, H]  activations (bf16 recommended -- MXU peak is bf16)
    w_t : [H, H]  pre-transposed weight (in_features x out_features)
    b   : [1, H]  f32 bias (applied once, in f32, in the epilogue)
    """
    B, H = x.shape
    assert w_t.shape == (H, H), w_t.shape
    assert b.shape == (1, H), b.shape

    if out_dtype is None:
        out_dtype = x.dtype
    in_item = x.dtype.itemsize
    out_item = jnp.dtype(out_dtype).itemsize
    if vmem_budget_bytes is None:
        vmem_budget_bytes = _vmem_budget_bytes()

    if tm is None:
        tm = _divisor_tile(B, 512, 8)
    assert B % tm == 0, (B, tm)

    # --- choose path: collapse K (and N) when the full W^T slab fits VMEM ---
    single_fp = (
        2 * tm * H * in_item        # x tiles (double-buffered)
        + 2 * H * H * in_item       # full W^T slab
        + 2 * H * 4                 # bias
        + 2 * tm * H * out_item     # output tiles
    )
    single_pass = (tn is None and tk is None and single_fp <= vmem_budget_bytes) or (
        tn == H and tk == H and single_fp <= vmem_budget_bytes
    )

    # Advisory cost: x / W^T / b read once, output written once.
    cost = pl.CostEstimate(
        flops=2 * B * H * H,
        transcendentals=0,
        bytes_accessed=(x.size * in_item + w_t.size * w_t.dtype.itemsize
                        + b.size * b.dtype.itemsize + B * H * out_item),
    )

    if single_pass:
        vmem_limit = int(min(vmem_budget_bytes, max(2 * single_fp, 32 << 20)))
        return pl.pallas_call(
            _single_pass_kernel,
            out_shape=jax.ShapeDtypeStruct((B, H), out_dtype),
            grid_spec=pltpu.PrefetchScalarGridSpec(
                num_scalar_prefetch=0,
                grid=(B // tm,),
                in_specs=[
                    pl.BlockSpec((tm, H), lambda i: (i, 0)),  # x (LHS + residual)
                    pl.BlockSpec((H, H), lambda i: (0, 0)),   # full W^T (resident)
                    pl.BlockSpec((1, H), lambda i: (0, 0)),   # bias
                ],
                out_specs=pl.BlockSpec((tm, H), lambda i: (i, 0)),
            ),
            compiler_params=pltpu.CompilerParams(
                dimension_semantics=("parallel",),
                vmem_limit_bytes=vmem_limit,
            ),
            cost_estimate=cost,
        )(x, w_t, b)

    # --- general K-tiled path (tn == tk so the residual folds in at k == j) ---
    if tn is None or tk is None:
        t = _divisor_tile(H, 512, 128)
        tn = t if tn is None else tn
        tk = t if tk is None else tk
    assert tn == tk, "K-tiled residual fusion requires tn == tk"
    assert H % tn == 0 and H % tk == 0, (H, tn, tk)

    ktiled_fp = (2 * tm * tk * in_item + 2 * tk * tn * in_item + 2 * tn * 4
                 + 2 * tm * tn * out_item + tm * tn * 4)
    vmem_limit = int(min(vmem_budget_bytes, max(2 * ktiled_fp, 32 << 20)))

    grid = (B // tm, H // tn, H // tk)  # reduction axis last
    return pl.pallas_call(
        _ktiled_kernel,
        out_shape=jax.ShapeDtypeStruct((B, H), out_dtype),
        grid_spec=pltpu.PrefetchScalarGridSpec(
            num_scalar_prefetch=0,
            grid=grid,
            in_specs=[
                pl.BlockSpec((tm, tk), lambda i, j, k: (i, k)),  # x (LHS + residual)
                pl.BlockSpec((tk, tn), lambda i, j, k: (k, j)),  # W^T
                pl.BlockSpec((1, tn), lambda i, j, k: (0, j)),   # bias (epilogue)
            ],
            out_specs=pl.BlockSpec((tm, tn), lambda i, j, k: (i, j)),
            scratch_shapes=[pltpu.VMEM((tm, tn), jnp.float32)],
        ),
        compiler_params=pltpu.CompilerParams(
            dimension_semantics=("parallel", "parallel", "arbitrary"),
            vmem_limit_bytes=vmem_limit,
        ),
        cost_estimate=cost,
    )(x, w_t, b)


if __name__ == "__main__":
    # Small shapes; both code paths are exercised and checked.
    B, H = 128, 256

    key = jax.random.PRNGKey(0)
    kx, kw, kb = jax.random.split(key, 3)

    # bf16 activations/weights (MXU-native), f32 bias, f32 accumulation.
    x = jax.random.normal(kx, (B, H), dtype=jnp.float32).astype(jnp.bfloat16)
    w_t = (jax.random.normal(kw, (H, H), dtype=jnp.float32) * 0.02).astype(
        jnp.bfloat16
    )
    b = jax.random.normal(kb, (1, H), dtype=jnp.float32) * 0.02

    # Pure-JAX reference: module(x) + x with module = Linear (f32 math).
    ref = (
        jnp.dot(x, w_t, preferred_element_type=jnp.float32)
        + b
        + x.astype(jnp.float32)
    )

    # Path 1: single-pass (K and N collapsed; grid = (B//tm,)).
    out1 = jax.block_until_ready(resnet_forward(x, w_t, b, tm=64))
    # Path 2: K-tiled with the residual folded at k == j (forced explicitly).
    out2 = jax.block_until_ready(resnet_forward(x, w_t, b, tm=64, tn=128, tk=128))

    for name, out in (("single_pass", out1), ("ktiled", out2)):
        assert out.shape == (B, H) and out.dtype == jnp.bfloat16, (name, out.shape, out.dtype)
        err = float(jnp.max(jnp.abs(out.astype(jnp.float32) - ref)))
        assert jnp.allclose(out.astype(jnp.float32), ref, atol=3e-2, rtol=3e-2), (
            f"{name} mismatch, max_err={err}"
        )

    print("KERNEL_OK")
</pallas_src>

<mosaic_0001>
module attributes {stable_mosaic.version = 11 : i64} {
  func.func @_single_pass_kernel(%arg0: i32, %arg1: memref<64x256xbf16, #tpu.memory_space<vmem>>, %arg2: memref<256x256xbf16, #tpu.memory_space<vmem>>, %arg3: memref<1x256xf32, #tpu.memory_space<vmem>>, %arg4: memref<64x256xbf16, #tpu.memory_space<vmem>>) attributes {dimension_semantics = [#tpu.dimension_semantics<parallel>], iteration_bounds = array<i64: 2>, scalar_prefetch = 0 : i64, scratch_operands = 0 : i64, tpu.core_type = #tpu.core_type<tc>, window_params = [{transform_indices = @transform_0, window_bounds = array<i64: 64, 256>}, {pipeline_mode = #tpu.pipeline_mode<synchronous>, transform_indices = @transform_1, window_bounds = array<i64: 256, 256>}, {pipeline_mode = #tpu.pipeline_mode<synchronous>, transform_indices = @transform_2, window_bounds = array<i64: 1, 256>}, {transform_indices = @transform_3, window_bounds = array<i64: 64, 256>}]} {
    %c0 = arith.constant 0 : index
    %c0_0 = arith.constant 0 : index
    %0 = vector.load %arg1[%c0, %c0_0] : memref<64x256xbf16, #tpu.memory_space<vmem>>, vector<64x256xbf16>
    %c0_1 = arith.constant 0 : index
    %c0_2 = arith.constant 0 : index
    %1 = vector.load %arg2[%c0_1, %c0_2] : memref<256x256xbf16, #tpu.memory_space<vmem>>, vector<256x256xbf16>
    %cst = arith.constant dense<0.000000e+00> : vector<64x256xf32>
    %2 = tpu.matmul %0, %1, %cst {dimension_numbers = #tpu.dot_dimension_numbers<[1], [0], [0], [1], [0, 0, 1, 1], [], []>} : vector<64x256xbf16>, vector<256x256xbf16>, vector<64x256xf32> -> vector<64x256xf32>
    %c0_3 = arith.constant 0 : index
    %c0_4 = arith.constant 0 : index
    %3 = vector.load %arg3[%c0_3, %c0_4] : memref<1x256xf32, #tpu.memory_space<vmem>>, vector<1x256xf32>
    %4 = vector.broadcast %3 : vector<1x256xf32> to vector<64x256xf32>
    %5 = arith.addf %2, %4 : vector<64x256xf32>
    %c0_5 = arith.constant 0 : index
    %c0_6 = arith.constant 0 : index
    %6 = vector.load %arg1[%c0_5, %c0_6] : memref<64x256xbf16, #tpu.memory_space<vmem>>, vector<64x256xbf16>
    %7 = arith.extf %6 : vector<64x256xbf16> to vector<64x256xf32>
    %8 = arith.addf %5, %7 : vector<64x256xf32>
    %9 = arith.truncf %8 : vector<64x256xf32> to vector<64x256xbf16>
    %c0_7 = arith.constant 0 : index
    %c0_8 = arith.constant 0 : index
    %10 = vector.load %arg4[%c0_7, %c0_8] : memref<64x256xbf16, #tpu.memory_space<vmem>>, vector<64x256xbf16>
    tpu.vector_store %arg4[%c0_7, %c0_8], %9 {strides = array<i32>} : memref<64x256xbf16, #tpu.memory_space<vmem>>, vector<64x256xbf16>,
    return
  }
  func.func @transform_0(%arg0: i32) -> (i32, i32) {
    %c0_i32 = arith.constant 0 : i32
    %c0_i32_0 = arith.constant 0 : i32
    return %arg0, %c0_i32 : i32, i32
  }
  func.func @transform_1(%arg0: i32) -> (i32, i32) {
    %c0_i32 = arith.constant 0 : i32
    %c0_i32_0 = arith.constant 0 : i32
    %c0_i32_1 = arith.constant 0 : i32
    return %c0_i32, %c0_i32_0 : i32, i32
  }
  func.func @transform_2(%arg0: i32) -> (i32, i32) {
    %c0_i32 = arith.constant 0 : i32
    %c0_i32_0 = arith.constant 0 : i32
    %c0_i32_1 = arith.constant 0 : i32
    return %c0_i32, %c0_i32_0 : i32, i32
  }
  func.func @transform_3(%arg0: i32) -> (i32, i32) {
    %c0_i32 = arith.constant 0 : i32
    %c0_i32_0 = arith.constant 0 : i32
    return %arg0, %c0_i32 : i32, i32
  }
}

</mosaic_0001>

<bundles_post_ra>
// kernel: tpu_custom_call.1
= control target key start
LH: loop header
LB: loop body
LE: loop exit
PB: predicated region body
PF: predicated region fallthrough
CT: control target
= control target key end

     0   :  { %8 = vsyncpa [#allocation3], 0  ;;  %s1435_s0 = inlined_call_operand.hbm [shape: bf16[128,256], index: 0, kind: input, shape index: {}]   ;;  %s1436_s1 = inlined_call_operand.hbm [shape: bf16[256,256], index: 1, kind: input, shape index: {}]   ;;  %s1437_s2 = inlined_call_operand.hbm [shape: f32[1,256], index: 2, kind: input, shape index: {}]   ;;  %s1438_s3 = inlined_call_operand.hbm [shape: bf16[128,256], index: 3, kind: output, shape index: {}]  }
   0x1   :  { %10 = vsyncpa [#allocation3 + $0x1], 0 }
   0x2   :  { %11 = vsyncpa [#allocation6], 0 }
   0x3   :  { %12 = vsyncpa [#allocation4], 0 }
   0x4   :  { %14 = vsyncpa [#allocation4 + $0x1], 0  ;;  %s1227_s12 = smov 0   ;;  %s1229_s13 = smov 0  }
   0x5   :  { %s1231_s14 = smov 0   ;;  %s1233_s15 = smov 0  }
   0x6 LB: > { %s1248_s16 = sadd.s32 4294967295, %s1199_s15   ;;  %s744_s17 = sadd.s32 4294967294, %s1199_s15   ;;  %s1199_s15 = sphi %s1233_s15, %s1448_s15   ;;  %s1195_s14 = sphi %s1231_s14, %s1447_s14   ;;  %s1191_s13 = sphi %s1229_s13, %s1446_s13   ;;  %s1187_s12 = sphi %s1227_s12, %s1445_s12  }
   0x7   : > { %p40_p0 = scmp.ne.s32.totalorder %s1191_s13, %s1187_s12  ;;  %p41_p1 = scmp.eq.s32.totalorder %s1248_s16, 0 }
   0x8   : > { %p106_p2 = scmp.eq.s32.totalorder %s1248_s16, 1  ;;  %p112_p3 = scmp.eq.s32.totalorder %s744_s17, 1 }
   0x9   : > { %p1257_p4 = por %p41_p1, %p40_p0  ;;  %p745_p5 = scmp.ge.s32.totalorder %s1199_s15, 1 }
   0xa   : > { %p1262_p6 = por %p112_p3, %p40_p0  ;;  %p119_p7 = scmp.lt.s32.totalorder %s1199_s15, 3 }
   0xb   : > { %s130_s22 = sshll.u32 %s1436_s1, 4  ;;  %s1201_s24 = smov [#allocation5]   ;;  %s131_s22 = int_to_ptr.hbm [resolvable:$true] %s130_s22 }
   0xc   : > { %p1270_p8 = pnand %p745_p5, %p119_p7  ;;  %s132_s25 = sshll.u32 %s1201_s24, 4  ;;  %s133_s25 = int_to_ptr.vmem [resolvable:$true] %s132_s25 }
   0xd   : > { %s145_s28 = sshll.u32 %s1437_s2, 4  ;;  %s1202_s29 = smov 128   ;;  %s146_s28 = int_to_ptr.hbm [resolvable:$true] %s145_s28 }
   0xe   : > { %p980_p9 = pneg %p1270_p8  ;;  %s1203_s30 = smov 8  }
   0xf   : > { %s1204_s4 = smov [#allocation7]   ;;  %s1286_s6 = sadd.s32 1, %s1199_s15  }
  0x10   : > { %p981_p10 = pnand %p980_p9, %p41_p1  ;;  %s147_s5 = sshll.u32 %s1204_s4, 4  ;;  %s148_s5 = int_to_ptr.vmem [resolvable:$true] %s147_s5 }
  0x11   : > { %s27_s7 = sadd.s32 1, %s1195_s14  ;;  %s24_s8 = ssub.s32 %s1199_s15, %s1286_s6 }
  0x12   : > { %983 = dma.hbm_to_vmem [thread:$0]  (!%p981_p10), %s131_s22, 4096, %s133_s25, [#allocation6], %s1202_s29, %s1202_s29, %s1203_s30  }
  0x13   : > { %986 = dma.hbm_to_vmem [thread:$0]  (!%p981_p10), %s146_s28, 32, %s148_s5, [#allocation6]  }
  0x14   : > { %p34_p12 = scmp.ne.s32.totalorder %s1195_s14, %s1191_s13  ;;  %p25_p13 = scmp.eq.s32.totalorder %s24_s8, 0 }
  0x15   : > { %p35_p0 = scmp.eq.s32.totalorder %s1199_s15, 0  ;;  %p997_p5 = scmp.lt.s32.totalorder %s1199_s15, 2 }
  0x16   : > { %p1296_p3 = por %p106_p2, %p34_p12  ;;  %s158_s11 = sand.u32 1, %s1195_s14  }
  0x17   : > { %s1302_s10 = scalar_select %p25_p13, %s1195_s14, %s27_s7  }
  0x18   : > { %p36_p7 = por %p35_p0, %p34_p12  ;;  %s749_s17 = sshll.u32 %s158_s11, 6 }
  0x19   : > { %s925_s20 = sshll.u32 %s1199_s15, 6  ;;  %s162_s25 = scalar_lea.vmem [#allocation2], %s749_s17 }
  0x1a   : > { %s168_s24 = scalar_lea.hbm %s1435_s0, %s925_s20  ;;  %s171_s26 = sshll.u32 %s162_s25, 4  ;;  %s172_s26 = int_to_ptr.vmem [resolvable:$true] %s171_s26 }
  0x1b   : > { %s169_s27 = sshll.u32 %s168_s24, 4  ;;  %p1309_p2 = pnand %p997_p5, %p36_p7  ;;  %s170_s27 = int_to_ptr.hbm [resolvable:$true] %s169_s27 }
  0x1c   : > { %s159_s4 = scalar_lea.sflag [#allocation3], %s158_s11  ;;  %s1099_s5 = sshra.s32 %s170_s27, 4  ;;  %s1100_s5 = int_to_ptr.hbm [resolvable:$true] %s1099_s5 }
  0x1d   : > { %s1101_s7 = scalar_lea.hbm %s1100_s5, 64  ;;  %p1103_p10 = pneg %p1309_p2 }
  0x1e   : > { %p1102_p9 = scmp.ne.s32.totalorder %s1100_s5, %s1101_s7  ;;  %s1106_s20 = scalar_lea.hbm %s1435_s0, 128 }
  0x1f   : > { %p1107_p0 = scmp.lt.s32.totalorder %s1100_s5, %s1435_s0  ;;  %p1108_p5 = scmp.lt.s32.totalorder %s1106_s20, %s1101_s7 }
  0x20   : > { %p1104_p12 = pnand %p1103_p10, %p1102_p9 }
  0x21   : > { %p1109_p7 = por %p1108_p5, %p1107_p0 }
  0x22   : > { %p1105_p13 = pneg %p1104_p12 }
  0x24   : > { %p1110_p11 = pnand %p1109_p7, %p1105_p13 }
  0x26   : > { %1113 = shalt.err (!%p1110_p11)
}
  0x27   : > { %990 = dma.hbm_to_vmem [thread:$0]  (!%p1309_p2), %s170_s27, 1024, %s172_s26, %s159_s4, %s1202_s29, %s1202_s29, %s1203_s30  }
  0x28   : > { %183 = sbr.rel (%p1270_p8) target bundleno = 284 (0x11c), region = 32  ;;  %s1329_s11 = sand.u32 (!%p1270_p8), 1, %s1191_s13  }
  0x29   : > { %s754_s24 = sshll.u32 (!%p1270_p8), %s1329_s11, 6  ;;  %s186_s25 = scalar_lea.sflag (!%p1270_p8), [#allocation3], %s1329_s11 }
  0x2a   : > { %s1335_s5 = scalar_lea.vmem (!%p1270_p8), [#allocation2], %s754_s24 }
  0x2d   : > { %1174 = dma.done.wait (%p1257_p4), %s186_s25, 1024  }
  0x2e   : > { %1176 = vsyncadd (%p1257_p4), %s186_s25, 4294966272 }
  0x2f   : > { %1178 = dma.done.wait (%p41_p1), [#allocation6], 4128  }
  0x30   : > { %1180 = vsyncadd (%p41_p1), [#allocation6], 4294963168  ;;  %v848_v0 = vld [vmem:[#allocation5 + $0x70] sm:$0xf]  ;;  %v949_v1 = vld [vmem:[#allocation5 + $0x74] sm:$0xf0] }
  0x31   : > { %v912_v2 = vld [vmem:[#allocation5 + $0xf0] sm:$0xf]  ;;  %v849_v3 = vor.u32 %v949_v1, %v848_v0  ;;  %v965_v4 = vld [vmem:[#allocation5 + $0xf4] sm:$0xf0]  ;;  %v948_v5 = vld [vmem:[#allocation5 + $0x74] sm:$0xf] }
  0x32   : > { %v850_v6 = vld [vmem:[#allocation5 + $0x78] sm:$0xf0]  ;;  %v913_v7 = vor.u32 %v965_v4, %v912_v2  ;;  %v964_v9 = vld [vmem:[#allocation5 + $0xf4] sm:$0xf]  ;;  %v840_v11 = vld [vmem:[#allocation5 + $0x60] sm:$0xf] }
  0x33   : > { %v853_v8 = vor.u32 %v948_v5, %v850_v6  ;;  %v914_v10 = vld [vmem:[#allocation5 + $0xf8] sm:$0xf0]  ;;  %471 = vmatpush.bf16.msra.mxu0 %v849_v3  ;;  %v947_v13 = vld [vmem:[#allocation5 + $0x64] sm:$0xf0]  ;;  %v904_v14 = vld [vmem:[#allocation5 + $0xe0] sm:$0xf] }
  0x34   : > { %v917_v12 = vor.u32 %v964_v9, %v914_v10  ;;  %v963_v15 = vld [vmem:[#allocation5 + $0xe4] sm:$0xf0]  ;;  %500 = vmatpush.bf16.msra.mxu1 %v913_v7  ;;  %v841_v16 = vor.u32 %v947_v13, %v840_v11  ;;  %v946_v18 = vld [vmem:[#allocation5 + $0x64] sm:$0xf]  ;;  %v842_v19 = vld [vmem:[#allocation5 + $0x68] sm:$0xf0] }
  0x35   : > { %529 = vmatpush.bf16.msra.mxu2 %v853_v8  ;;  %v905_v17 = vor.u32 %v963_v15, %v904_v14  ;;  %v962_v20 = vld [vmem:[#allocation5 + $0xe4] sm:$0xf]  ;;  %v845_v21 = vor.u32 %v946_v18, %v842_v19  ;;  %v906_v22 = vld [vmem:[#allocation5 + $0xe8] sm:$0xf0]  ;;  %v832_v23 = vld [vmem:[#allocation5 + $0x50] sm:$0xf] }
  0x36   : > { %558 = vmatpush.bf16.msra.mxu3 %v917_v12  ;;  %v945_v24 = vld [vmem:[#allocation5 + $0x54] sm:$0xf0]  ;;  %v909_v25 = vor.u32 %v962_v20, %v906_v22  ;;  %v896_v26 = vld [vmem:[#allocation5 + $0xd0] sm:$0xf]  ;;  %v944_v28 = vld [vmem:[#allocation5 + $0x54] sm:$0xf] }
  0x37   : > { %v961_v27 = vld [vmem:[#allocation5 + $0xd4] sm:$0xf0]  ;;  %472 = vmatpush.bf16.msra.mxu0 %v841_v16  ;;  %v833_v29 = vor.u32 %v945_v24, %v832_v23  ;;  %v834_v30 = vld [vmem:[#allocation5 + $0x58] sm:$0xf0]  ;;  %v960_v31 = vld [vmem:[#allocation5 + $0xd4] sm:$0xf] }
  0x38   : > { %v898_v32 = vld [vmem:[#allocation5 + $0xd8] sm:$0xf0]  ;;  %501 = vmatpush.bf16.msra.mxu1 %v905_v17  ;;  %v897_v33 = vor.u32 %v961_v27, %v896_v26  ;;  %v837_v34 = vor.u32 %v944_v28, %v834_v30  ;;  %v824_v35 = vld [vmem:[#allocation5 + $0x40] sm:$0xf]  ;;  %v943_v36 = vld [vmem:[#allocation5 + $0x44] sm:$0xf0] }
  0x39   : > { %530 = vmatpush.bf16.msra.mxu2 %v845_v21  ;;  %v888_v37 = vld [vmem:[#allocation5 + $0xc0] sm:$0xf]  ;;  %v901_v38 = vor.u32 %v960_v31, %v898_v32  ;;  %v959_v39 = vld [vmem:[#allocation5 + $0xc4] sm:$0xf0]  ;;  %v942_v40 = vld [vmem:[#allocation5 + $0x44] sm:$0xf]  ;;  %v825_v44 = vor.u32 %v943_v36, %v824_v35 }
  0x3a   : > { %559 = vmatpush.bf16.msra.mxu3 %v909_v25  ;;  %v826_v41 = vld [vmem:[#allocation5 + $0x48] sm:$0xf0]  ;;  %v958_v42 = vld [vmem:[#allocation5 + $0xc4] sm:$0xf]  ;;  %v889_v45 = vor.u32 %v959_v39, %v888_v37  ;;  %v816_v47 = vld [vmem:[#allocation5 + $0x30] sm:$0xf] }
  0x3b   : > { %v890_v43 = vld [vmem:[#allocation5 + $0xc8] sm:$0xf0]  ;;  %473 = vmatpush.bf16.msra.mxu0 %v833_v29  ;;  %v829_v46 = vor.u32 %v942_v40, %v826_v41  ;;  %v941_v48 = vld [vmem:[#allocation5 + $0x34] sm:$0xf0]  ;;  %v880_v49 = vld [vmem:[#allocation5 + $0xb0] sm:$0xf] }
  0x3c   : > { %502 = vmatpush.bf16.msra.mxu1 %v897_v33  ;;  %v893_v50 = vor.u32 %v958_v42, %v890_v43  ;;  %v957_v51 = vld [vmem:[#allocation5 + $0xb4] sm:$0xf0]  ;;  %v940_v52 = vld [vmem:[#allocation5 + $0x34] sm:$0xf]  ;;  %v818_v53 = vld [vmem:[#allocation5 + $0x38] sm:$0xf0]  ;;  %v817_v56 = vor.u32 %v941_v48, %v816_v47 }
  0x3d   : > { %531 = vmatpush.bf16.msra.mxu2 %v837_v34  ;;  %v956_v54 = vld [vmem:[#allocation5 + $0xb4] sm:$0xf]  ;;  %v882_v55 = vld [vmem:[#allocation5 + $0xb8] sm:$0xf0]  ;;  %v881_v57 = vor.u32 %v957_v51, %v880_v49  ;;  %v821_v58 = vor.u32 %v940_v52, %v818_v53  ;;  %v808_v59 = vld [vmem:[#allocation5 + $0x20] sm:$0xf] }
  0x3e   : > { %560 = vmatpush.bf16.msra.mxu3 %v901_v38  ;;  %v939_v60 = vld [vmem:[#allocation5 + $0x24] sm:$0xf0]  ;;  %v872_v61 = vld [vmem:[#allocation5 + $0xa0] sm:$0xf]  ;;  %v885_v62 = vor.u32 %v956_v54, %v882_v55  ;;  %v938_v0 = vld [vmem:[#allocation5 + $0x24] sm:$0xf] }
  0x3f   : > { %474 = vmatpush.bf16.msra.mxu0 %v825_v44  ;;  %v955_v63 = vld [vmem:[#allocation5 + $0xa4] sm:$0xf0]  ;;  %v810_v1 = vld [vmem:[#allocation5 + $0x28] sm:$0xf0]  ;;  %v954_v2 = vld [vmem:[#allocation5 + $0xa4] sm:$0xf]  ;;  %v809_v4 = vor.u32 %v939_v60, %v808_v59 }
  0x40   : > { %503 = vmatpush.bf16.msra.mxu1 %v889_v45  ;;  %v874_v3 = vld [vmem:[#allocation5 + $0xa8] sm:$0xf0]  ;;  %v873_v5 = vor.u32 %v955_v63, %v872_v61  ;;  %v813_v6 = vor.u32 %v938_v0, %v810_v1  ;;  %v800_v7 = vld [vmem:[#allocation5 + $0x10] sm:$0xf]  ;;  %v937_v8 = vld [vmem:[#allocation5 + $0x14] sm:$0xf0] }
  0x41   : > { %532 = vmatpush.bf16.msra.mxu2 %v829_v46  ;;  %v864_v9 = vld [vmem:[#allocation5 + $0x90] sm:$0xf]  ;;  %v877_v10 = vor.u32 %v954_v2, %v874_v3  ;;  %v953_v11 = vld [vmem:[#allocation5 + $0x94] sm:$0xf0]  ;;  %v936_v12 = vld [vmem:[#allocation5 + $0x14] sm:$0xf]  ;;  %v801_v16 = vor.u32 %v937_v8, %v800_v7 }
  0x42   : > { %561 = vmatpush.bf16.msra.mxu3 %v893_v50  ;;  %v802_v13 = vld [vmem:[#allocation5 + $0x18] sm:$0xf0]  ;;  %v952_v14 = vld [vmem:[#allocation5 + $0x94] sm:$0xf]  ;;  %v865_v17 = vor.u32 %v953_v11, %v864_v9  ;;  %v792_v19 = vld [vmem:[#allocation5] sm:$0xf] }
  0x43   : > { %475 = vmatpush.bf16.msra.mxu0 %v817_v56  ;;  %v866_v15 = vld [vmem:[#allocation5 + $0x98] sm:$0xf0]  ;;  %v805_v18 = vor.u32 %v936_v12, %v802_v13  ;;  %v935_v20 = vld [vmem:[#allocation5 + $0x4] sm:$0xf0]  ;;  %v856_v21 = vld [vmem:[#allocation5 + $0x80] sm:$0xf] }
  0x44   : > { %504 = vmatpush.bf16.msra.mxu1 %v881_v57  ;;  %v869_v22 = vor.u32 %v952_v14, %v866_v15  ;;  %v951_v23 = vld [vmem:[#allocation5 + $0x84] sm:$0xf0]  ;;  %v934_v24 = vld [vmem:[#allocation5 + $0x4] sm:$0xf]  ;;  %v794_v25 = vld [vmem:[#allocation5 + $0x8] sm:$0xf0]  ;;  %v793_v28 = vor.u32 %v935_v20, %v792_v19 }
  0x45   : > { %533 = vmatpush.bf16.msra.mxu2 %v821_v58  ;;  %v950_v26 = vld [vmem:[#allocation5 + $0x84] sm:$0xf]  ;;  %v858_v27 = vld [vmem:[#allocation5 + $0x88] sm:$0xf0]  ;;  %v760_v29 = vld [vmem:[%s1335_s5] sm:$0xf]  ;;  %v857_v31 = vor.u32 %v951_v23, %v856_v21  ;;  %v797_v32 = vor.u32 %v934_v24, %v794_v25 }
  0x46   : > { %562 = vmatpush.bf16.msra.mxu3 %v885_v62  ;;  %v927_v30 = vld [vmem:[%s1335_s5 + $0x4] sm:$0xf0]  ;;  %v926_v33 = vld [vmem:[%s1335_s5 + $0x4] sm:$0xf]  ;;  %v762_v34 = vld [vmem:[%s1335_s5 + $0x8] sm:$0xf0]  ;;  %v861_v35 = vor.u32 %v950_v26, %v858_v27 }
  0x47   : > { %476 = vmatpush.bf16.msra.mxu0 %v809_v4  ;;  %v761_v36 = vor.u32 %v927_v30, %v760_v29  ;;  %v765_v37 = vor.u32 %v926_v33, %v762_v34  ;;  %v768_v38 = vld [vmem:[%s1335_s5 + $0x10] sm:$0xf]  ;;  %v929_v39 = vld [vmem:[%s1335_s5 + $0x14] sm:$0xf0]  ;;  %v928_v40 = vld [vmem:[%s1335_s5 + $0x14] sm:$0xf] }
  0x48   : > { %505 = vmatpush.bf16.msra.mxu1 %v873_v5  ;;  %v770_v41 = vld [vmem:[%s1335_s5 + $0x18] sm:$0xf0]  ;;  %v769_v42 = vor.u32 %v929_v39, %v768_v38  ;;  %v776_v44 = vld [vmem:[%s1335_s5 + $0x20] sm:$0xf]  ;;  %v931_v45 = vld [vmem:[%s1335_s5 + $0x24] sm:$0xf0] }
  0x49   : > { %534 = vmatpush.bf16.msra.mxu2 %v813_v6  ;;  %v773_v43 = vor.u32 %v928_v40, %v770_v41  ;;  %v930_v46 = vld [vmem:[%s1335_s5 + $0x24] sm:$0xf]  ;;  %v778_v47 = vld [vmem:[%s1335_s5 + $0x28] sm:$0xf0]  ;;  %v777_v48 = vor.u32 %v931_v45, %v776_v44  ;;  %v784_v50 = vld [vmem:[%s1335_s5 + $0x30] sm:$0xf] }
  0x4a   : > { %563 = vmatpush.bf16.msra.mxu3 %v877_v10  ;;  %v781_v49 = vor.u32 %v930_v46, %v778_v47  ;;  %v933_v51 = vld [vmem:[%s1335_s5 + $0x34] sm:$0xf0]  ;;  %v932_v52 = vld [vmem:[%s1335_s5 + $0x34] sm:$0xf]  ;;  %v786_v53 = vld [vmem:[%s1335_s5 + $0x38] sm:$0xf0] }
  0x4b   : > { %477 = vmatpush.bf16.msra.mxu0 %v801_v16  ;;  %v785_v54 = vor.u32 %v933_v51, %v784_v50  ;;  %v789_v55 = vor.u32 %v932_v52, %v786_v53  ;;  %v265_v56 = vld [vmem:[#allocation7] sm:$0x3]  ;;  %v226_v11 = vld [vmem:[%s1335_s5 + $0x8] sm:$0xff]  ;;  %s1372_s18 = scalar_lea.vmem [#allocation8], %s754_s24  ;;  %v227_v23 = vld [vmem:[%s1335_s5 + $0x10] sm:$0xff]  ;;  %s967_s23 = sshll.u32 %s1248_s16, 6 }
  0x4c   : > { %506 = vmatpush.bf16.msra.mxu1 %v865_v17  ;;  %v1361_v57 = vperm.slane %v265_v56, 0  ;;  %v225_v61 = vld [vmem:[%s1335_s5] sm:$0xff]  ;;  %v1365_v62 = vperm.slane %v265_v56, 1  ;;  %v589_v15 = vunpack.c.l.bf16 %v226_v11  ;;  %v228_v39 = vld [vmem:[%s1335_s5 + $0x18] sm:$0xff]  ;;  %s648_s26 = scalar_lea.hbm %s1438_s3, %s967_s23  ;;  %s649_s16 = sshll.u32 %s1372_s18, 4  ;;  %s650_s16 = int_to_ptr.vmem [resolvable:$true] %s649_s16 }
  0x4d   : > { %535 = vmatpush.bf16.msra.mxu2 %v805_v18  ;;  %v587_v0 = vunpack.c.l.bf16 %v225_v61  ;;  %v588_v4 = vunpack.c.h.bf16 %v225_v61  ;;  %v590_v18 = vunpack.c.h.bf16 %v226_v11  ;;  %v594_v46 = vunpack.c.h.bf16 %v228_v39  ;;  %v229_v51 = vld [vmem:[%s1335_s5 + $0x20] sm:$0xff]  ;;  %s651_s27 = sshll.u32 %s648_s26, 4  ;;  %s636_s28 = scalar_lea.sflag [#allocation4], %s1329_s11  ;;  %s652_s27 = int_to_ptr.hbm [resolvable:$true] %s651_s27 }
  0x4e   : > { %564 = vmatpush.bf16.msra.mxu3 %v869_v22  ;;  %v595_v56 = vunpack.c.l.bf16 %v229_v51  ;;  %v596_v61 = vunpack.c.h.bf16 %v229_v51  ;;  %s1143_s4 = sshra.s32 %s652_s27, 4  ;;  %s1149_s20 = scalar_lea.hbm %s1438_s3, 128  ;;  %s1144_s4 = int_to_ptr.hbm [resolvable:$true] %s1143_s4 }
  0x4f   : > { %478 = vmatpush.bf16.msra.mxu0 %v793_v28  ;;  %v591_v28 = vunpack.c.l.bf16 %v227_v23  ;;  %s1145_s7 = scalar_lea.hbm %s1144_s4, 64  ;;  %p1150_p11 = scmp.lt.s32.totalorder %s1144_s4, %s1438_s3 }
  0x50   : > { %507 = vmatpush.bf16.msra.mxu1 %v857_v31  ;;  %p1146_p1 = scmp.ne.s32.totalorder %s1144_s4, %s1145_s7  ;;  %p1151_p2 = scmp.lt.s32.totalorder %s1149_s20, %s1145_s7 }
  0x51   : > { %536 = vmatpush.bf16.msra.mxu2 %v797_v32  ;;  %v592_v32 = vunpack.c.h.bf16 %v227_v23 }
  0x52   : > { %565 = vmatpush.bf16.msra.mxu3 %v861_v35  ;;  %479 = vmatmul.bf16.vlgmr.msra.gmra.mxu0 %v761_v36  ;;  %p1147_p4 = pnand %p1146_p1, %p1296_p3  ;;  %p1152_p9 = por %p1151_p2, %p1150_p11 }
  0x53   : > { %508 = vmatmul.bf16.vlgmr.msra.gmra.mxu1 %v765_v37 }
  0x54   : > { %537 = vmatmul.bf16.vlgmr.msra.gmra.mxu2 %v761_v36  ;;  %p1148_p8 = pneg %p1147_p4 }
  0x55   : > { %566 = vmatmul.bf16.vlgmr.msra.gmra.mxu3 %v765_v37 }
  0x56   : > { %p1153_p10 = pnand %p1152_p9, %p1148_p8 }
  0x62   : > { %484 = vmatmul.bf16.gmra.mxu0 %v769_v42 }
  0x63   : > { %513 = vmatmul.bf16.gmra.mxu1 %v773_v43 }
  0x64   : > { %542 = vmatmul.bf16.gmra.mxu2 %v769_v42 }
  0x65   : > { %571 = vmatmul.bf16.gmra.mxu3 %v773_v43  ;;  %v593_v43 = vunpack.c.l.bf16 %v228_v39 }
  0x72   : > { %489 = vmatmul.bf16.gmra.mxu0 %v777_v48 }
  0x73   : > { %518 = vmatmul.bf16.gmra.mxu1 %v781_v49 }
  0x74   : > { %547 = vmatmul.bf16.gmra.mxu2 %v777_v48 }
  0x75   : > { %576 = vmatmul.bf16.gmra.mxu3 %v781_v49 }
  0x82   : > { %494 = vmatmul.bf16.gmra.mxu0 %v785_v54 }
  0x83   : > { %523 = vmatmul.bf16.gmra.mxu1 %v789_v55 }
  0x84   : > { %552 = vmatmul.bf16.gmra.mxu2 %v785_v54 }
  0x85   : > { %581 = vmatmul.bf16.gmra.mxu3 %v789_v55 }
  0xcf   : > { %v480_v58 = vpop.f32.mrf.mxu0 }
  0xd0   : > { %v509_v59 = vpop.f32.mrf.mxu1  ;;  %v481_v60 = vadd.f32 %v480_v58, %v1361_v57 }
  0xd2   : > { %v510_v63 = vadd.f32 %v509_v59, %v481_v60 }
  0xd4   : > { %v603_v7 = vadd.f32 %v587_v0, %v510_v63 }
  0xd7   : > { %v538_v1 = vpop.f32.mrf.mxu2  ;;  %v482_v5 = vpop.f32.mrf.mxu0 }
  0xd8   : > { %v539_v2 = vadd.f32 %v538_v1, %v1365_v62  ;;  %v567_v3 = vpop.f32.mrf.mxu3  ;;  %v511_v6 = vpop.f32.mrf.mxu1  ;;  %v483_v10 = vadd.f32 %v482_v5, %v1361_v57  ;;  %v230_v5 = vld [vmem:[%s1335_s5 + $0x28] sm:$0xff] }
  0xda   : > { %v568_v8 = vadd.f32 %v567_v3, %v539_v2  ;;  %v512_v14 = vadd.f32 %v511_v6, %v483_v10 }
  0xdc   : > { %v604_v9 = vadd.f32 %v588_v4, %v568_v8  ;;  %v605_v24 = vadd.f32 %v589_v15, %v512_v14 }
  0xde   : > { %v619_v12 = vpack.c.bf16 %v604_v9, %v603_v7  ;;  %v597_v9 = vunpack.c.l.bf16 %v230_v5 }
  0xdf   : > { %v540_v13 = vpop.f32.mrf.mxu2  ;;  %v485_v19 = vpop.f32.mrf.mxu0 }
  0xe0   : > { %627 = vst [vmem:[%s1372_s18] sm:$0xff] %v619_v12  ;;  %v541_v16 = vadd.f32 %v540_v13, %v1365_v62  ;;  %v569_v17 = vpop.f32.mrf.mxu3  ;;  %v514_v20 = vpop.f32.mrf.mxu1  ;;  %v486_v22 = vadd.f32 %v485_v19, %v1361_v57  ;;  %v598_v12 = vunpack.c.h.bf16 %v230_v5 }
  0xe2   : > { %v570_v21 = vadd.f32 %v569_v17, %v541_v16  ;;  %v515_v27 = vadd.f32 %v514_v20, %v486_v22  ;;  %v231_v16 = vld [vmem:[%s1335_s5 + $0x30] sm:$0xff] }
  0xe3   : > { %v599_v22 = vunpack.c.l.bf16 %v231_v16 }
  0xe4   : > { %v606_v25 = vadd.f32 %v590_v18, %v570_v21  ;;  %v607_v35 = vadd.f32 %v591_v28, %v515_v27 }
  0xe6   : > { %v620_v26 = vpack.c.bf16 %v606_v25, %v605_v24 }
  0xe7   : > { %v543_v29 = vpop.f32.mrf.mxu2  ;;  %v487_v33 = vpop.f32.mrf.mxu0 }
  0xe8   : > { %628 = vst [vmem:[%s1372_s18 + $0x8] sm:$0xff] %v620_v26  ;;  %v544_v30 = vadd.f32 %v543_v29, %v1365_v62  ;;  %v572_v31 = vpop.f32.mrf.mxu3  ;;  %v516_v34 = vpop.f32.mrf.mxu1  ;;  %v488_v38 = vadd.f32 %v487_v33, %v1361_v57  ;;  %v600_v26 = vunpack.c.h.bf16 %v231_v16 }
  0xea   : > { %v573_v36 = vadd.f32 %v572_v31, %v544_v30  ;;  %v517_v42 = vadd.f32 %v516_v34, %v488_v38 }
  0xec   : > { %v608_v37 = vadd.f32 %v592_v32, %v573_v36  ;;  %v609_v52 = vadd.f32 %v593_v43, %v517_v42  ;;  %v232_v32 = vld [vmem:[%s1335_s5 + $0x38] sm:$0xff] }
  0xed   : > { %v602_v39 = vunpack.c.h.bf16 %v232_v32 }
  0xee   : > { %v621_v40 = vpack.c.bf16 %v608_v37, %v607_v35  ;;  %v601_v37 = vunpack.c.l.bf16 %v232_v32 }
  0xef   : > { %v545_v41 = vpop.f32.mrf.mxu2  ;;  %v490_v47 = vpop.f32.mrf.mxu0 }
  0xf0   : > { %629 = vst [vmem:[%s1372_s18 + $0x10] sm:$0xff] %v621_v40  ;;  %v546_v44 = vadd.f32 %v545_v41, %v1365_v62  ;;  %v574_v45 = vpop.f32.mrf.mxu3  ;;  %v519_v48 = vpop.f32.mrf.mxu1  ;;  %v491_v50 = vadd.f32 %v490_v47, %v1361_v57 }
  0xf2   : > { %v575_v49 = vadd.f32 %v574_v45, %v546_v44  ;;  %v520_v55 = vadd.f32 %v519_v48, %v491_v50 }
  0xf4   : > { %v610_v53 = vadd.f32 %v594_v46, %v575_v49  ;;  %v611_v0 = vadd.f32 %v595_v56, %v520_v55 }
  0xf6   : > { %v622_v54 = vpack.c.bf16 %v610_v53, %v609_v52 }
  0xf7   : > { %v548_v58 = vpop.f32.mrf.mxu2  ;;  %v492_v63 = vpop.f32.mrf.mxu0 }
  0xf8   : > { %630 = vst [vmem:[%s1372_s18 + $0x18] sm:$0xff] %v622_v54  ;;  %v549_v59 = vadd.f32 %v548_v58, %v1365_v62  ;;  %v577_v60 = vpop.f32.mrf.mxu3  ;;  %v521_v2 = vpop.f32.mrf.mxu1  ;;  %v493_v4 = vadd.f32 %v492_v63, %v1361_v57 }
  0xfa   : > { %v578_v1 = vadd.f32 %v577_v60, %v549_v59  ;;  %v522_v8 = vadd.f32 %v521_v2, %v493_v4 }
  0xfc   : > { %v612_v3 = vadd.f32 %v596_v61, %v578_v1  ;;  %v613_v17 = vadd.f32 %v597_v9, %v522_v8 }
  0xfe   : > { %v623_v6 = vpack.c.bf16 %v612_v3, %v611_v0 }
  0xff   : > { %v550_v7 = vpop.f32.mrf.mxu2  ;;  %v495_v13 = vpop.f32.mrf.mxu0 }
 0x100   : > { %631 = vst [vmem:[%s1372_s18 + $0x20] sm:$0xff] %v623_v6  ;;  %v551_v10 = vadd.f32 %v550_v7, %v1365_v62  ;;  %v579_v11 = vpop.f32.mrf.mxu3  ;;  %v496_v15 = vadd.f32 %v495_v13, %v1361_v57  ;;  %v524_v19 = vpop.f32.mrf.mxu1 }
 0x102   : > { %v580_v14 = vadd.f32 %v579_v11, %v551_v10  ;;  %v525_v21 = vadd.f32 %v524_v19, %v496_v15 }
 0x104   : > { %v614_v18 = vadd.f32 %v598_v12, %v580_v14  ;;  %v615_v28 = vadd.f32 %v599_v22, %v525_v21 }
 0x106   : > { %v624_v20 = vpack.c.bf16 %v614_v18, %v613_v17 }
 0x107   : > { %v553_v23 = vpop.f32.mrf.mxu2  ;;  %v497_v27 = vpop.f32.mrf.mxu0 }
 0x108   : > { %632 = vst [vmem:[%s1372_s18 + $0x28] sm:$0xff] %v624_v20  ;;  %v554_v24 = vadd.f32 %v553_v23, %v1365_v62  ;;  %v582_v25 = vpop.f32.mrf.mxu3  ;;  %v498_v31 = vadd.f32 %v497_v27, %v1361_v57  ;;  %v526_v34 = vpop.f32.mrf.mxu1 }
 0x10a   : > { %v583_v29 = vadd.f32 %v582_v25, %v554_v24  ;;  %v527_v36 = vadd.f32 %v526_v34, %v498_v31 }
 0x10c   : > { %v616_v30 = vadd.f32 %v600_v26, %v583_v29  ;;  %v617_v41 = vadd.f32 %v601_v37, %v527_v36 }
 0x10e   : > { %v625_v33 = vpack.c.bf16 %v616_v30, %v615_v28 }
 0x10f   : > { %v555_v35 = vpop.f32.mrf.mxu2 }
 0x110   : > { %633 = vst [vmem:[%s1372_s18 + $0x30] sm:$0xff] %v625_v33  ;;  %v556_v38 = vadd.f32 %v555_v35, %v1365_v62  ;;  %v584_v40 = vpop.f32.mrf.mxu3 }
 0x112   : > { %v585_v57 = vadd.f32 %v584_v40, %v556_v38 }
 0x114   : > { %v618_v42 = vadd.f32 %v602_v39, %v585_v57 }
 0x116   : > { %v626_v43 = vpack.c.bf16 %v618_v42, %v617_v41 }
 0x118   : > { %634 = vst [vmem:[%s1372_s18 + $0x38] sm:$0xff] %v626_v43 }
 0x119   : > { %1156 = shalt.err (!%p1153_p10)
}
 0x11a   : > { %s1205_s11 = smov 128   ;;  %s1206_s24 = smov 8  }
 0x11b   : > { %978 = dma.vmem_to_hbm [thread:$0]  (%p1296_p3), %s650_s16, 1024, %s652_s27, %s636_s28, %s1205_s11, %s1205_s11, %s1206_s24  }
 0x11c PF: > { %s666_s25 = sand.u32 1, %s1187_s12   ;;  %p1444_p12 = scmp.ge.s32.totalorder %s1199_s15, 2 }
 0x11d   : > { %s667_s5 = scalar_lea.sflag [#allocation4], %s666_s25 }
 0x11e   : > { %p992_p13 = pnand %p1444_p12, %p1262_p6 }
 0x120   : > { %p993_p0 = pneg %p992_p13 }
 0x122   : > { %1182 = dma.done.wait (%p993_p0), %s667_s5, 1024  }
 0x123   : > { %1184 = vsyncadd (%p993_p0), %s667_s5, 4294966272  ;;  %p17_p5 = scmp.ge.s32.totalorder %s1286_s6, 4   ;;  %s1445_s12 = smov %s1191_s13 }
 0x124   : > { %s1446_s13 = smov %s1195_s14  ;;  %s1447_s14 = smov %s1302_s10 }
 0x125   : > { %s1448_s15 = smov %s1286_s6  ;;  %19 = sbr.rel (!%p17_p5) target bundleno = 6 (0x6), region = 85 }
 0x12a   :  { %673 = vsyncpa [#allocation3], 1 }
 0x12b   :  { %675 = vsyncpa [#allocation3 + $0x1], 1 }
 0x12c   :  { %676 = vsyncpa [#allocation6], 1 }
 0x12d   :  { %677 = vsyncpa [#allocation4], 1 }
 0x12e   :  { %679 = vsyncpa [#allocation4 + $0x1], 1 }

</bundles_post_ra>
